<compile_context>
chip_gen: v7x
topology: tpu7x:2x2x1
jax: 0.10.0
libtpu: 0.0.40
codegen_flags: <defaults>
</compile_context>

<pallas_src>
import functools

import jax
import jax.numpy as jnp
from jax.experimental import pallas as pl
from jax.experimental.pallas import tpu as pltpu


def _round_up(x: int, m: int) -> int:
    return ((x + m - 1) // m) * m


def _leaky_relu(z, negative_slope=0.2):
    return jnp.where(z > 0, z, negative_slope * z)


def classifier_kernel(x_ref,
                      w1_ref, b1_ref,
                      w2_ref, b2_ref,
                      w3_ref, b3_ref,
                      w4_ref, b4_ref,
                      o_ref):
    """4 MXU matmuls (bf16 inputs, f32 accumulation) + f32 bias + LeakyReLU."""
    h = jnp.dot(x_ref[...], w1_ref[...],
                preferred_element_type=jnp.float32) + b1_ref[...]
    h = _leaky_relu(h)

    h = jnp.dot(h.astype(jnp.bfloat16), w2_ref[...],
                preferred_element_type=jnp.float32) + b2_ref[...]
    h = _leaky_relu(h)

    h = jnp.dot(h.astype(jnp.bfloat16), w3_ref[...],
                preferred_element_type=jnp.float32) + b3_ref[...]
    h = _leaky_relu(h)

    out = jnp.dot(h.astype(jnp.bfloat16), w4_ref[...],
                  preferred_element_type=jnp.float32) + b4_ref[...]
    o_ref[...] = out.astype(o_ref.dtype)


def _choose_batch_tile(batch: int, max_tile: int) -> int:
    """Pick a large, MXU-friendly batch tile.

    * big enough to fill the MXU M dimension and amortize per-step overhead,
    * a multiple of 8 (sublane) unless it equals the full batch,
    * leaves >= 2 grid steps when the batch is large enough (v7x megacore).
    """
    if batch > max_tile:
        return max_tile
    half = batch // 2
    if half >= 256 and half % 8 == 0:
        return half          # >=2 grid steps, each still >=256 MXU rows
    return batch             # small batch: single full tile


@functools.partial(jax.jit, static_argnames=("max_batch_tile",))
def classifier_forward(x, params, max_batch_tile=512):
    """Runs the Classifier forward pass with a Pallas kernel.

    x: (B, input_length) float32
    params: dict with w1..w4 as (in, out), b1..b4 as (1, out)
    """
    B, F = x.shape

    # bf16 matmul operands; biases stay f32 for the post-matmul elementwise.
    xb = x.astype(jnp.bfloat16)
    w1 = params["w1"].astype(jnp.bfloat16)
    w2 = params["w2"].astype(jnp.bfloat16)
    w3 = params["w3"].astype(jnp.bfloat16)
    b1 = params["b1"].astype(jnp.float32)
    b2 = params["b2"].astype(jnp.float32)
    b3 = params["b3"].astype(jnp.float32)

    # Lane-dense output: pad last layer to a multiple of 128 classes (zeros),
    # slice back to the real class count after the kernel.
    C = params["w4"].shape[1]
    C_pad = _round_up(max(C, 128), 128)
    w4 = params["w4"]
    b4 = params["b4"]
    if C_pad != C:
        w4 = jnp.pad(w4, ((0, 0), (0, C_pad - C)))
        b4 = jnp.pad(b4, ((0, 0), (0, C_pad - C)))
    w4 = w4.astype(jnp.bfloat16)
    b4 = b4.astype(jnp.float32)

    tb = _choose_batch_tile(B, max_batch_tile)
    grid = (pl.cdiv(B, tb),)

    # Constant (0, 0) block index: weights/biases live in VMEM for the whole
    # grid and are not re-copied between steps; only x and the output stream.
    def const2d(arr):
        return pl.BlockSpec(arr.shape, lambda i: (0, 0))

    flops = 2 * B * (F * 512 + 512 * 512 + 512 * 128 + 128 * C_pad)
    bytes_accessed = (
        xb.size * 2
        + (w1.size + w2.size + w3.size + w4.size) * 2
        + (b1.size + b2.size + b3.size + b4.size) * 4
        + B * C_pad * 4)

    # TODO(synk): input_length (K=32) is left unpadded; pad x/w1 to K=128 only
    # if profiling ever shows layer 1 dominating.
    out = pl.pallas_call(
        classifier_kernel,
        out_shape=jax.ShapeDtypeStruct((B, C_pad), jnp.float32),
        grid_spec=pltpu.PrefetchScalarGridSpec(
            num_scalar_prefetch=0,
            grid=grid,
            in_specs=[
                pl.BlockSpec((tb, F), lambda i: (i, 0)),   # x batch tile
                const2d(w1), const2d(b1),
                const2d(w2), const2d(b2),
                const2d(w3), const2d(b3),
                const2d(w4), const2d(b4),
            ],
            out_specs=pl.BlockSpec((tb, C_pad), lambda i: (i, 0)),
        ),
        compiler_params=pltpu.CompilerParams(
            dimension_semantics=("parallel",)),
        cost_estimate=pl.CostEstimate(
            flops=flops, transcendentals=0, bytes_accessed=bytes_accessed),
    )(xb, w1, b1, w2, b2, w3, b3, w4, b4)

    return out[:, :C]


def init_params(key, input_length, classes_count):
    """Deterministic synthetic parameters (shapes match the nn.Linear layers)."""
    dims = [(input_length, 512), (512, 512), (512, 128), (128, classes_count)]
    params = {}
    for idx, (din, dout) in enumerate(dims, start=1):
        key, kw, kb = jax.random.split(key, 3)
        bound = 1.0 / jnp.sqrt(jnp.float32(din))
        params[f"w{idx}"] = jax.random.uniform(
            kw, (din, dout), jnp.float32, minval=-bound, maxval=bound)
        params[f"b{idx}"] = jax.random.uniform(
            kb, (1, dout), jnp.float32, minval=-bound, maxval=bound)
    return params


def reference_forward(x, params):
    h = x
    for idx in range(1, 4):
        h = jnp.dot(h, params[f"w{idx}"]) + params[f"b{idx}"]
        h = jnp.where(h > 0, h, 0.2 * h)
    return jnp.dot(h, params["w4"]) + params["b4"]


if __name__ == "__main__":
    key = jax.random.PRNGKey(0)
    key, kx, kx2, kp = jax.random.split(key, 4)

    input_length = 32
    classes_count = 10
    params = init_params(kp, input_length, classes_count)

    # Small primary test (single tile).
    batch = 8
    x = jax.random.normal(kx, (batch, input_length), jnp.float32)
    out = jax.block_until_ready(classifier_forward(x, params))
    ref = reference_forward(x, params)
    assert out.shape == (batch, classes_count)
    assert jnp.allclose(out, ref, atol=5e-2, rtol=5e-2), \
        "mismatch vs reference (small batch)"

    # Larger batch: exercises the 512-row tile, a multi-step grid and a
    # partial last tile (padded rows computed but never written back).
    batch2 = 777
    x2 = jax.random.normal(kx2, (batch2, input_length), jnp.float32)
    out2 = jax.block_until_ready(classifier_forward(x2, params))
    ref2 = reference_forward(x2, params)
    assert out2.shape == (batch2, classes_count)
    assert jnp.allclose(out2, ref2, atol=5e-2, rtol=5e-2), \
        "mismatch vs reference (tiled batch)"

    print("KERNEL_OK")
</pallas_src>

<mosaic_0001>
module attributes {stable_mosaic.version = 11 : i64} {
  func.func @classifier_kernel(%arg0: i32, %arg1: memref<8x32xbf16, #tpu.memory_space<vmem>>, %arg2: memref<32x512xbf16, #tpu.memory_space<vmem>>, %arg3: memref<1x512xf32, #tpu.memory_space<vmem>>, %arg4: memref<512x512xbf16, #tpu.memory_space<vmem>>, %arg5: memref<1x512xf32, #tpu.memory_space<vmem>>, %arg6: memref<512x128xbf16, #tpu.memory_space<vmem>>, %arg7: memref<1x128xf32, #tpu.memory_space<vmem>>, %arg8: memref<128x128xbf16, #tpu.memory_space<vmem>>, %arg9: memref<1x128xf32, #tpu.memory_space<vmem>>, %arg10: memref<8x128xf32, #tpu.memory_space<vmem>>) attributes {dimension_semantics = [#tpu.dimension_semantics<parallel>], iteration_bounds = array<i64: 1>, scalar_prefetch = 0 : i64, scratch_operands = 0 : i64, tpu.core_type = #tpu.core_type<tc>, window_params = [{transform_indices = @transform_0, window_bounds = array<i64: 8, 32>}, {pipeline_mode = #tpu.pipeline_mode<synchronous>, transform_indices = @transform_1, window_bounds = array<i64: 32, 512>}, {pipeline_mode = #tpu.pipeline_mode<synchronous>, transform_indices = @transform_2, window_bounds = array<i64: 1, 512>}, {pipeline_mode = #tpu.pipeline_mode<synchronous>, transform_indices = @transform_3, window_bounds = array<i64: 512, 512>}, {pipeline_mode = #tpu.pipeline_mode<synchronous>, transform_indices = @transform_4, window_bounds = array<i64: 1, 512>}, {pipeline_mode = #tpu.pipeline_mode<synchronous>, transform_indices = @transform_5, window_bounds = array<i64: 512, 128>}, {pipeline_mode = #tpu.pipeline_mode<synchronous>, transform_indices = @transform_6, window_bounds = array<i64: 1, 128>}, {pipeline_mode = #tpu.pipeline_mode<synchronous>, transform_indices = @transform_7, window_bounds = array<i64: 128, 128>}, {pipeline_mode = #tpu.pipeline_mode<synchronous>, transform_indices = @transform_8, window_bounds = array<i64: 1, 128>}, {transform_indices = @transform_9, window_bounds = array<i64: 8, 128>}]} {
    %c0 = arith.constant 0 : index
    %c0_0 = arith.constant 0 : index
    %0 = vector.load %arg1[%c0, %c0_0] : memref<8x32xbf16, #tpu.memory_space<vmem>>, vector<8x32xbf16>
    %c0_1 = arith.constant 0 : index
    %c0_2 = arith.constant 0 : index
    %1 = vector.load %arg2[%c0_1, %c0_2] : memref<32x512xbf16, #tpu.memory_space<vmem>>, vector<32x512xbf16>
    %cst = arith.constant dense<0.000000e+00> : vector<8x512xf32>
    %2 = tpu.matmul %0, %1, %cst {dimension_numbers = #tpu.dot_dimension_numbers<[1], [0], [0], [1], [0, 0, 1, 1], [], []>} : vector<8x32xbf16>, vector<32x512xbf16>, vector<8x512xf32> -> vector<8x512xf32>
    %c0_3 = arith.constant 0 : index
    %c0_4 = arith.constant 0 : index
    %3 = vector.load %arg3[%c0_3, %c0_4] : memref<1x512xf32, #tpu.memory_space<vmem>>, vector<1x512xf32>
    %4 = vector.broadcast %3 : vector<1x512xf32> to vector<8x512xf32>
    %5 = arith.addf %2, %4 : vector<8x512xf32>
    %cst_5 = arith.constant 0.000000e+00 : f32
    %6 = vector.broadcast %cst_5 : f32 to vector<8x512xf32>
    %7 = arith.cmpf ogt, %5, %6 : vector<8x512xf32>
    %cst_6 = arith.constant 2.000000e-01 : f32
    %8 = vector.broadcast %cst_6 : f32 to vector<8x512xf32>
    %9 = arith.mulf %8, %5 : vector<8x512xf32>
    %10 = arith.select %7, %5, %9 : vector<8x512xi1>, vector<8x512xf32>
    %11 = arith.truncf %10 : vector<8x512xf32> to vector<8x512xbf16>
    %c0_7 = arith.constant 0 : index
    %c0_8 = arith.constant 0 : index
    %12 = vector.load %arg4[%c0_7, %c0_8] : memref<512x512xbf16, #tpu.memory_space<vmem>>, vector<512x512xbf16>
    %cst_9 = arith.constant dense<0.000000e+00> : vector<8x512xf32>
    %13 = tpu.matmul %11, %12, %cst_9 {dimension_numbers = #tpu.dot_dimension_numbers<[1], [0], [0], [1], [0, 0, 1, 1], [], []>} : vector<8x512xbf16>, vector<512x512xbf16>, vector<8x512xf32> -> vector<8x512xf32>
    %c0_10 = arith.constant 0 : index
    %c0_11 = arith.constant 0 : index
    %14 = vector.load %arg5[%c0_10, %c0_11] : memref<1x512xf32, #tpu.memory_space<vmem>>, vector<1x512xf32>
    %15 = vector.broadcast %14 : vector<1x512xf32> to vector<8x512xf32>
    %16 = arith.addf %13, %15 : vector<8x512xf32>
    %cst_12 = arith.constant 0.000000e+00 : f32
    %17 = vector.broadcast %cst_12 : f32 to vector<8x512xf32>
    %18 = arith.cmpf ogt, %16, %17 : vector<8x512xf32>
    %cst_13 = arith.constant 2.000000e-01 : f32
    %19 = vector.broadcast %cst_13 : f32 to vector<8x512xf32>
    %20 = arith.mulf %19, %16 : vector<8x512xf32>
    %21 = arith.select %18, %16, %20 : vector<8x512xi1>, vector<8x512xf32>
    %22 = arith.truncf %21 : vector<8x512xf32> to vector<8x512xbf16>
    %c0_14 = arith.constant 0 : index
    %c0_15 = arith.constant 0 : index
    %23 = vector.load %arg6[%c0_14, %c0_15] : memref<512x128xbf16, #tpu.memory_space<vmem>>, vector<512x128xbf16>
    %cst_16 = arith.constant dense<0.000000e+00> : vector<8x128xf32>
    %24 = tpu.matmul %22, %23, %cst_16 {dimension_numbers = #tpu.dot_dimension_numbers<[1], [0], [0], [1], [0, 0, 1, 1], [], []>} : vector<8x512xbf16>, vector<512x128xbf16>, vector<8x128xf32> -> vector<8x128xf32>
    %c0_17 = arith.constant 0 : index
    %c0_18 = arith.constant 0 : index
    %25 = vector.load %arg7[%c0_17, %c0_18] : memref<1x128xf32, #tpu.memory_space<vmem>>, vector<1x128xf32>
    %26 = vector.broadcast %25 : vector<1x128xf32> to vector<8x128xf32>
    %27 = arith.addf %24, %26 : vector<8x128xf32>
    %cst_19 = arith.constant 0.000000e+00 : f32
    %28 = vector.broadcast %cst_19 : f32 to vector<8x128xf32>
    %29 = arith.cmpf ogt, %27, %28 : vector<8x128xf32>
    %cst_20 = arith.constant 2.000000e-01 : f32
    %30 = vector.broadcast %cst_20 : f32 to vector<8x128xf32>
    %31 = arith.mulf %30, %27 : vector<8x128xf32>
    %32 = arith.select %29, %27, %31 : vector<8x128xi1>, vector<8x128xf32>
    %33 = arith.truncf %32 : vector<8x128xf32> to vector<8x128xbf16>
    %c0_21 = arith.constant 0 : index
    %c0_22 = arith.constant 0 : index
    %34 = vector.load %arg8[%c0_21, %c0_22] : memref<128x128xbf16, #tpu.memory_space<vmem>>, vector<128x128xbf16>
    %cst_23 = arith.constant dense<0.000000e+00> : vector<8x128xf32>
    %35 = tpu.matmul %33, %34, %cst_23 {dimension_numbers = #tpu.dot_dimension_numbers<[1], [0], [0], [1], [0, 0, 1, 1], [], []>} : vector<8x128xbf16>, vector<128x128xbf16>, vector<8x128xf32> -> vector<8x128xf32>
    %c0_24 = arith.constant 0 : index
    %c0_25 = arith.constant 0 : index
    %36 = vector.load %arg9[%c0_24, %c0_25] : memref<1x128xf32, #tpu.memory_space<vmem>>, vector<1x128xf32>
    %37 = vector.broadcast %36 : vector<1x128xf32> to vector<8x128xf32>
    %38 = arith.addf %35, %37 : vector<8x128xf32>
    %c0_26 = arith.constant 0 : index
    %c0_27 = arith.constant 0 : index
    %39 = vector.load %arg10[%c0_26, %c0_27] : memref<8x128xf32, #tpu.memory_space<vmem>>, vector<8x128xf32>
    tpu.vector_store %arg10[%c0_26, %c0_27], %38 {strides = array<i32>} : memref<8x128xf32, #tpu.memory_space<vmem>>, vector<8x128xf32>,
    return
  }
  func.func @transform_0(%arg0: i32) -> (i32, i32) {
    %c0_i32 = arith.constant 0 : i32
    %c0_i32_0 = arith.constant 0 : i32
    return %arg0, %c0_i32 : i32, i32
  }
  func.func @transform_1(%arg0: i32) -> (i32, i32) {
    %c0_i32 = arith.constant 0 : i32
    %c0_i32_0 = arith.constant 0 : i32
    %c0_i32_1 = arith.constant 0 : i32
    return %c0_i32, %c0_i32_0 : i32, i32
  }
  func.func @transform_2(%arg0: i32) -> (i32, i32) {
    %c0_i32 = arith.constant 0 : i32
    %c0_i32_0 = arith.constant 0 : i32
    %c0_i32_1 = arith.constant 0 : i32
    return %c0_i32, %c0_i32_0 : i32, i32
  }
  func.func @transform_3(%arg0: i32) -> (i32, i32) {
    %c0_i32 = arith.constant 0 : i32
    %c0_i32_0 = arith.constant 0 : i32
    %c0_i32_1 = arith.constant 0 : i32
    return %c0_i32, %c0_i32_0 : i32, i32
  }
  func.func @transform_4(%arg0: i32) -> (i32, i32) {
    %c0_i32 = arith.constant 0 : i32
    %c0_i32_0 = arith.constant 0 : i32
    %c0_i32_1 = arith.constant 0 : i32
    return %c0_i32, %c0_i32_0 : i32, i32
  }
  func.func @transform_5(%arg0: i32) -> (i32, i32) {
    %c0_i32 = arith.constant 0 : i32
    %c0_i32_0 = arith.constant 0 : i32
    %c0_i32_1 = arith.constant 0 : i32
    return %c0_i32, %c0_i32_0 : i32, i32
  }
  func.func @transform_6(%arg0: i32) -> (i32, i32) {
    %c0_i32 = arith.constant 0 : i32
    %c0_i32_0 = arith.constant 0 : i32
    %c0_i32_1 = arith.constant 0 : i32
    return %c0_i32, %c0_i32_0 : i32, i32
  }
  func.func @transform_7(%arg0: i32) -> (i32, i32) {
    %c0_i32 = arith.constant 0 : i32
    %c0_i32_0 = arith.constant 0 : i32
    %c0_i32_1 = arith.constant 0 : i32
    return %c0_i32, %c0_i32_0 : i32, i32
  }
  func.func @transform_8(%arg0: i32) -> (i32, i32) {
    %c0_i32 = arith.constant 0 : i32
    %c0_i32_0 = arith.constant 0 : i32
    %c0_i32_1 = arith.constant 0 : i32
    return %c0_i32, %c0_i32_0 : i32, i32
  }
  func.func @transform_9(%arg0: i32) -> (i32, i32) {
    %c0_i32 = arith.constant 0 : i32
    %c0_i32_0 = arith.constant 0 : i32
    return %arg0, %c0_i32 : i32, i32
  }
}

</mosaic_0001>

<bundles_post_ra>
// kernel: classifier_forward.1
= control target key start
LH: loop header
LB: loop body
LE: loop exit
PB: predicated region body
PF: predicated region fallthrough
CT: control target
= control target key end

     0   :  { %v2187_v2 = vmov 0   ;;  %vm105_vm0 = vcmask 261120   ;;  %s2838_s0 = inlined_call_operand.vmem [shape: bf16[8,32], index: 0, kind: input, shape index: {}]   ;;  %s2839_s1 = inlined_call_operand.vmem [shape: bf16[32,512], index: 1, kind: input, shape index: {}]   ;;  %s2840_s2 = inlined_call_operand.vmem [shape: f32[1,512], index: 2, kind: input, shape index: {}]   ;;  %s2841_s3 = inlined_call_operand.vmem [shape: bf16[512,512], index: 3, kind: input, shape index: {}]   ;;  %s2842_s4 = inlined_call_operand.vmem [shape: f32[1,512], index: 4, kind: input, shape index: {}]   ;;  %s2843_s5 = inlined_call_operand.vmem [shape: bf16[512,128], index: 5, kind: input, shape index: {}]   ;;  %s2844_s6 = inlined_call_operand.vmem [shape: f32[1,128], index: 6, kind: input, shape index: {}]   ;;  %s2845_s7 = inlined_call_operand.vmem [shape: bf16[128,128], index: 7, kind: input, shape index: {}]   ;;  %s2846_s8 = inlined_call_operand.vmem [shape: f32[1,128], index: 8, kind: input, shape index: {}]   ;;  %s2847_s9 = inlined_call_operand.hbm [shape: f32[8,128], index: 9, kind: output, shape index: {}]  }
   0x1   :  { %v1919_v0 = vld [vmem:[%s2839_s1 + $0x4] ss:$16 sps:$4 sm:$0xff]   ;;  %v1921_v1 = vld [vmem:[%s2839_s1] ss:$16 sps:$4 sm:$0xff]   ;;  %141 = vmatprep.mubr.bf16.mxu1 %v2187_v2  ;;  %v1927_v5 = vld [vmem:[%s2839_s1 + $0xc] ss:$16 sps:$4 sm:$0xff]  }
   0x2   :  { %109 = vmatprep.subr.bf16.mxu1 %v1919_v0  ;;  %v1922_v3 = vld [vmem:[%s2839_s1 + $0x24] ss:$16 sps:$4 sm:$0xff]   ;;  %v1924_v4 = vld [vmem:[%s2839_s1 + $0x20] ss:$16 sps:$4 sm:$0xff]   ;;  %v1925_v8 = vld [vmem:[%s2839_s1 + $0x8] ss:$16 sps:$4 sm:$0xff]  }
   0x3   :  { %110 = vmatpush1.bf16.msra.mxu1 %v1921_v1  ;;  %v34_v6 = vld [vmem:[%s2838_s0] sm:$0xf]  ;;  %v1931_v7 = vld [vmem:[%s2841_s3 + $0x4] ss:$16 sps:$4 sm:$0xff]   ;;  %v1930_v9 = vld [vmem:[%s2839_s1 + $0x2c] ss:$16 sps:$4 sm:$0xff]  }
   0x4   :  { %111 = vmatprep.subr.bf16.mxu1 %v1922_v3  ;;  %997 = vmatprep.subr.bf16.mxu0 %v1931_v7  ;;  %v1936_v10 = vld [vmem:[%s2841_s3] ss:$16 sps:$4 sm:$0xff]   ;;  %v1937_v11 = vld [vmem:[%s2841_s3 + $0x24] ss:$16 sps:$4 sm:$0xff]   ;;  %v1928_v12 = vld [vmem:[%s2839_s1 + $0x28] ss:$16 sps:$4 sm:$0xff]  }
   0x5   :  { %998 = vmatpush1.bf16.msra.mxu0 %v1936_v10  ;;  %v1942_v13 = vld [vmem:[%s2841_s3 + $0x20] ss:$16 sps:$4 sm:$0xff]   ;;  %v1943_v14 = vld [vmem:[%s2841_s3 + $0x44] ss:$16 sps:$4 sm:$0xff]   ;;  %v1935_v15 = vld [vmem:[%s2841_s3 + $0xc] ss:$16 sps:$4 sm:$0xff]  }
   0x6   :  { %999 = vmatprep.subr.bf16.mxu0 %v1937_v11  ;;  %v1948_v16 = vld [vmem:[%s2841_s3 + $0x40] ss:$16 sps:$4 sm:$0xff]   ;;  %v1933_v17 = vld [vmem:[%s2841_s3 + $0x8] ss:$16 sps:$4 sm:$0xff]   ;;  %v1949_v18 = vld [vmem:[%s2841_s3 + $0x64] ss:$16 sps:$4 sm:$0xff]  }
   0x7   :  { %112 = vmatpush1.bf16.msra.mxu1 %v1924_v4  ;;  %v1941_v19 = vld [vmem:[%s2841_s3 + $0x2c] ss:$16 sps:$4 sm:$0xff]   ;;  %v1939_v20 = vld [vmem:[%s2841_s3 + $0x28] ss:$16 sps:$4 sm:$0xff]   ;;  %v1954_v21 = vld [vmem:[%s2841_s3 + $0x60] ss:$16 sps:$4 sm:$0xff]  }
   0x8   :  { %150 = vmatprep.subr.bf16.mxu1 %v1927_v5  ;;  %v1955_v22 = vld [vmem:[%s2841_s3 + $0x84] ss:$16 sps:$4 sm:$0xff]   ;;  %v1947_v23 = vld [vmem:[%s2841_s3 + $0x4c] ss:$16 sps:$4 sm:$0xff]   ;;  %v1960_v24 = vld [vmem:[%s2841_s3 + $0x80] ss:$16 sps:$4 sm:$0xff]  }
   0x9   :  { %1000 = vmatpush1.bf16.msra.mxu0 %v1942_v13  ;;  %v1945_v25 = vld [vmem:[%s2841_s3 + $0x48] ss:$16 sps:$4 sm:$0xff]   ;;  %v1961_v26 = vld [vmem:[%s2841_s3 + $0xa4] ss:$16 sps:$4 sm:$0xff]   ;;  %v1953_v27 = vld [vmem:[%s2841_s3 + $0x6c] ss:$16 sps:$4 sm:$0xff]  }
   0xa   :  { %1658 = vmatmul.mubr.msk.bf16.vlgmr.msra.gmra.mrb[0].mxu1 %vm105_vm0, %v34_v6  ;;  %1001 = vmatprep.subr.bf16.mxu0 %v1943_v14  ;;  %v1951_v28 = vld [vmem:[%s2841_s3 + $0x68] ss:$16 sps:$4 sm:$0xff]   ;;  %v1966_v29 = vld [vmem:[%s2841_s3 + $0xa0] ss:$16 sps:$4 sm:$0xff]   ;;  %v1967_v30 = vld [vmem:[%s2841_s3 + $0xc4] ss:$16 sps:$4 sm:$0xff]  }
   0xb   :  { %151 = vmatpush1.bf16.msra.mxu1 %v1925_v8  ;;  %182 = vmatprep.mubr.bf16.mxu1 %v2187_v2  ;;  %v1959_v31 = vld [vmem:[%s2841_s3 + $0x8c] ss:$16 sps:$4 sm:$0xff]   ;;  %v1972_v32 = vld [vmem:[%s2841_s3 + $0xc0] ss:$16 sps:$4 sm:$0xff]   ;;  %v1957_v33 = vld [vmem:[%s2841_s3 + $0x88] ss:$16 sps:$4 sm:$0xff]  }
   0xc   :  { %152 = vmatprep.subr.bf16.mxu1 %v1930_v9  ;;  %v1973_v34 = vld [vmem:[%s2841_s3 + $0xe4] ss:$16 sps:$4 sm:$0xff]   ;;  %v1965_v35 = vld [vmem:[%s2841_s3 + $0xac] ss:$16 sps:$4 sm:$0xff]   ;;  %v1963_v36 = vld [vmem:[%s2841_s3 + $0xa8] ss:$16 sps:$4 sm:$0xff]  }
   0xd   :  { %1002 = vmatpush1.bf16.msra.mxu0 %v1948_v16  ;;  %v1978_v37 = vld [vmem:[%s2841_s3 + $0xe0] ss:$16 sps:$4 sm:$0xff]   ;;  %v1979_v38 = vld [vmem:[%s2841_s3 + $0x104] ss:$16 sps:$4 sm:$0xff]   ;;  %v1971_v39 = vld [vmem:[%s2841_s3 + $0xcc] ss:$16 sps:$4 sm:$0xff]  }
   0xe   :  { %1003 = vmatprep.subr.bf16.mxu0 %v1949_v18  ;;  %v1984_v40 = vld [vmem:[%s2841_s3 + $0x100] ss:$16 sps:$4 sm:$0xff]   ;;  %v1969_v41 = vld [vmem:[%s2841_s3 + $0xc8] ss:$16 sps:$4 sm:$0xff]   ;;  %v1985_v42 = vld [vmem:[%s2841_s3 + $0x124] ss:$16 sps:$4 sm:$0xff]  }
   0xf   :  { %153 = vmatpush1.bf16.msra.mxu1 %v1928_v12  ;;  %v1977_v43 = vld [vmem:[%s2841_s3 + $0xec] ss:$16 sps:$4 sm:$0xff]   ;;  %v1975_v44 = vld [vmem:[%s2841_s3 + $0xe8] ss:$16 sps:$4 sm:$0xff]   ;;  %v1990_v46 = vld [vmem:[%s2841_s3 + $0x120] ss:$16 sps:$4 sm:$0xff]  }
  0x10   :  { %1079 = vmatprep.subr.bf16.mxu1 %v1935_v15  ;;  %v1983_v45 = vld [vmem:[%s2841_s3 + $0x10c] ss:$16 sps:$4 sm:$0xff]   ;;  %v1991_v47 = vld [vmem:[%s2841_s3 + $0x144] ss:$16 sps:$4 sm:$0xff]   ;;  %v1996_v48 = vld [vmem:[%s2841_s3 + $0x140] ss:$16 sps:$4 sm:$0xff]  }
  0x11   :  { %1004 = vmatpush1.bf16.msra.mxu0 %v1954_v21  ;;  %v1981_v49 = vld [vmem:[%s2841_s3 + $0x108] ss:$16 sps:$4 sm:$0xff]   ;;  %v1997_v50 = vld [vmem:[%s2841_s3 + $0x164] ss:$16 sps:$4 sm:$0xff]   ;;  %v1989_v51 = vld [vmem:[%s2841_s3 + $0x12c] ss:$16 sps:$4 sm:$0xff]  }
  0x12   :  { %1659 = vmatmul.mubr.msk.bf16.vlgmr.msra.gmra.mrb[4].mxu1 %vm105_vm0, %v34_v6  ;;  %1005 = vmatprep.subr.bf16.mxu0 %v1955_v22  ;;  %v2002_v52 = vld [vmem:[%s2841_s3 + $0x160] ss:$16 sps:$4 sm:$0xff]   ;;  %v1987_v53 = vld [vmem:[%s2841_s3 + $0x128] ss:$16 sps:$4 sm:$0xff]   ;;  %v2003_v54 = vld [vmem:[%s2841_s3 + $0x184] ss:$16 sps:$4 sm:$0xff]  }
  0x13   :  { %1080 = vmatpush1.bf16.msra.mxu1 %v1933_v17  ;;  %v1995_v55 = vld [vmem:[%s2841_s3 + $0x14c] ss:$16 sps:$4 sm:$0xff]   ;;  %v2008_v56 = vld [vmem:[%s2841_s3 + $0x180] ss:$16 sps:$4 sm:$0xff]   ;;  %v1993_v57 = vld [vmem:[%s2841_s3 + $0x148] ss:$16 sps:$4 sm:$0xff]  }
  0x14   :  { %1081 = vmatprep.subr.bf16.mxu1 %v1941_v19  ;;  %v2009_v58 = vld [vmem:[%s2841_s3 + $0x1a4] ss:$16 sps:$4 sm:$0xff]   ;;  %v2001_v59 = vld [vmem:[%s2841_s3 + $0x16c] ss:$16 sps:$4 sm:$0xff]   ;;  %v2014_v60 = vld [vmem:[%s2841_s3 + $0x1a0] ss:$16 sps:$4 sm:$0xff]  }
  0x15   :  { %1006 = vmatpush1.bf16.msra.mxu0 %v1960_v24  ;;  %v1999_v61 = vld [vmem:[%s2841_s3 + $0x168] ss:$16 sps:$4 sm:$0xff]   ;;  %v2007_v62 = vld [vmem:[%s2841_s3 + $0x18c] ss:$16 sps:$4 sm:$0xff]   ;;  %v2015_v2 = vld [vmem:[%s2841_s3 + $0x1c4] ss:$16 sps:$4 sm:$0xff]  }
  0x16   :  { %1007 = vmatprep.subr.bf16.mxu0 %v1961_v26  ;;  %v2005_v63 = vld [vmem:[%s2841_s3 + $0x188] ss:$16 sps:$4 sm:$0xff]   ;;  %v2013_v0 = vld [vmem:[%s2841_s3 + $0x1ac] ss:$16 sps:$4 sm:$0xff]   ;;  %v2020_v5 = vld [vmem:[%s2841_s3 + $0x1c0] ss:$16 sps:$4 sm:$0xff]  }
  0x17   :  { %1082 = vmatpush1.bf16.msra.mxu1 %v1939_v20  ;;  %v2011_v1 = vld [vmem:[%s2841_s3 + $0x1a8] ss:$16 sps:$4 sm:$0xff]   ;;  %v2019_v3 = vld [vmem:[%s2841_s3 + $0x1cc] ss:$16 sps:$4 sm:$0xff]  }
  0x18   :  { %1083 = vmatprep.subr.bf16.mxu1 %v1947_v23  ;;  %v2017_v4 = vld [vmem:[%s2841_s3 + $0x1c8] ss:$16 sps:$4 sm:$0xff]  }
  0x19   :  { %1008 = vmatpush1.bf16.msra.mxu0 %v1966_v29 }
  0x1a   :  { %1009 = vmatprep.subr.bf16.mxu0 %v1967_v30 }
  0x1b   :  { %1084 = vmatpush1.bf16.msra.mxu1 %v1945_v25 }
  0x1c   :  { %1085 = vmatprep.subr.bf16.mxu1 %v1953_v27 }
  0x1d   :  { %1010 = vmatpush1.bf16.msra.mxu0 %v1972_v32 }
  0x1e   :  { %1011 = vmatprep.subr.bf16.mxu0 %v1973_v34 }
  0x1f   :  { %1086 = vmatpush1.bf16.msra.mxu1 %v1951_v28 }
  0x20   :  { %1087 = vmatprep.subr.bf16.mxu1 %v1959_v31 }
  0x21   :  { %1012 = vmatpush1.bf16.msra.mxu0 %v1978_v37 }
  0x22   :  { %1013 = vmatprep.subr.bf16.mxu0 %v1979_v38 }
  0x23   :  { %1088 = vmatpush1.bf16.msra.mxu1 %v1957_v33 }
  0x24   :  { %1089 = vmatprep.subr.bf16.mxu1 %v1965_v35 }
  0x25   :  { %1014 = vmatpush1.bf16.msra.mxu0 %v1984_v40 }
  0x26   :  { %1015 = vmatprep.subr.bf16.mxu0 %v1985_v42 }
  0x27   :  { %1090 = vmatpush1.bf16.msra.mxu1 %v1963_v36 }
  0x28   :  { %1091 = vmatprep.subr.bf16.mxu1 %v1971_v39 }
  0x29   :  { %1016 = vmatpush1.bf16.msra.mxu0 %v1990_v46 }
  0x2a   :  { %1017 = vmatprep.subr.bf16.mxu0 %v1991_v47 }
  0x2b   :  { %1092 = vmatpush1.bf16.msra.mxu1 %v1969_v41 }
  0x2c   :  { %1093 = vmatprep.subr.bf16.mxu1 %v1977_v43 }
  0x2d   :  { %1018 = vmatpush1.bf16.msra.mxu0 %v1996_v48 }
  0x2e   :  { %1019 = vmatprep.subr.bf16.mxu0 %v1997_v50 }
  0x2f   :  { %1094 = vmatpush1.bf16.msra.mxu1 %v1975_v44 }
  0x30   :  { %1095 = vmatprep.subr.bf16.mxu1 %v1983_v45 }
  0x31   :  { %1020 = vmatpush1.bf16.msra.mxu0 %v2002_v52 }
  0x32   :  { %1021 = vmatprep.subr.bf16.mxu0 %v2003_v54 }
  0x33   :  { %1096 = vmatpush1.bf16.msra.mxu1 %v1981_v49 }
  0x34   :  { %1097 = vmatprep.subr.bf16.mxu1 %v1989_v51 }
  0x35   :  { %1022 = vmatpush1.bf16.msra.mxu0 %v2008_v56 }
  0x36   :  { %1023 = vmatprep.subr.bf16.mxu0 %v2009_v58 }
  0x37   :  { %1098 = vmatpush1.bf16.msra.mxu1 %v1987_v53 }
  0x38   :  { %1099 = vmatprep.subr.bf16.mxu1 %v1995_v55 }
  0x39   :  { %1024 = vmatpush1.bf16.msra.mxu0 %v2014_v60 }
  0x3a   :  { %1025 = vmatprep.subr.bf16.mxu0 %v2015_v2 }
  0x3b   :  { %1100 = vmatpush1.bf16.msra.mxu1 %v1993_v57 }
  0x3c   :  { %1101 = vmatprep.subr.bf16.mxu1 %v2001_v59 }
  0x3d   :  { %1026 = vmatpush1.bf16.msra.mxu0 %v2020_v5 }
  0x3f   :  { %1102 = vmatpush1.bf16.msra.mxu1 %v1999_v61 }
  0x40   :  { %1103 = vmatprep.subr.bf16.mxu1 %v2007_v62 }
  0x43   :  { %1104 = vmatpush1.bf16.msra.mxu1 %v2005_v63 }
  0x44   :  { %1105 = vmatprep.subr.bf16.mxu1 %v2013_v0 }
  0x47   :  { %1106 = vmatpush1.bf16.msra.mxu1 %v2011_v1 }
  0x48   :  { %1107 = vmatprep.subr.bf16.mxu1 %v2019_v3 }
  0x4b   :  { %1108 = vmatpush1.bf16.msra.mxu1 %v2017_v4 }
  0x4c   :  { %14 = vsyncpa [#allocation3], 0  ;;  %v2021_v6 = vld [vmem:[%s2841_s3 + $0x1e4] ss:$16 sps:$4 sm:$0xff]   ;;  %v2025_v7 = vld [vmem:[%s2841_s3 + $0x1ec] ss:$16 sps:$4 sm:$0xff]   ;;  %v45_v12 = vlaneseq }
  0x4d   :  { %v2023_v8 = vld [vmem:[%s2841_s3 + $0x1e8] ss:$16 sps:$4 sm:$0xff]   ;;  %v2026_v9 = vld [vmem:[%s2841_s3 + $0x1e0] ss:$16 sps:$4 sm:$0xff]   ;;  %1027 = vmatprep.subr.bf16.mxu0 %v2021_v6  ;;  %1109 = vmatprep.subr.bf16.mxu1 %v2025_v7  ;;  %v2029_v10 = vld [vmem:[%s2841_s3 + $0x204] ss:$16 sps:$4 sm:$0xff]  }
  0x4e   :  { %1028 = vmatpush1.bf16.msra.mxu0 %v2026_v9  ;;  %v2032_v11 = vld [vmem:[%s2841_s3 + $0x20c] ss:$16 sps:$4 sm:$0xff]   ;;  %v2468_v13 = vshrl.u32 %v45_v12, 7  ;;  %v2474_v15 = vld [vmem:[%s2840_s2] sm:$0xf]  ;;  %vm2189_vm9 = vmmov 0  }
  0x4f   :  { %1110 = vmatpush1.bf16.msra.mxu1 %v2023_v8  ;;  %1038 = vmatprep.subr.bf16.mxu0 %v2029_v10  ;;  %v2027_v32 = vld [vmem:[%s2841_s3 + $0x200] ss:$16 sps:$4 sm:$0xff]   ;;  %v2030_v33 = vld [vmem:[%s2841_s3 + $0x208] ss:$16 sps:$4 sm:$0xff]   ;;  %v2035_v35 = vld [vmem:[%s2841_s3 + $0x224] ss:$16 sps:$4 sm:$0xff]  }
  0x50   :  { %1120 = vmatprep.subr.bf16.mxu1 %v2032_v11  ;;  %v47_v14 = vsub.s32 0, %v2468_v13  ;;  %v51_v16 = vsub.s32 1, %v2468_v13  ;;  %v59_v24 = vsub.s32 3, %v2468_v13  ;;  %v2038_v36 = vld [vmem:[%s2841_s3 + $0x22c] ss:$16 sps:$4 sm:$0xff]  }
  0x51   :  { %v2033_v39 = vld [vmem:[%s2841_s3 + $0x220] ss:$16 sps:$4 sm:$0xff]   ;;  %v2036_v42 = vld [vmem:[%s2841_s3 + $0x228] ss:$16 sps:$4 sm:$0xff]   ;;  %v2041_v43 = vld [vmem:[%s2841_s3 + $0x244] ss:$16 sps:$4 sm:$0xff]  }
  0x52   :  { %v48_v17 = vrot.slane %v2474_v15, %v47_v14  ;;  %v52_v18 = vrot.slane %v2474_v15, %v51_v16  ;;  %v60_v30 = vrot.slane %v2474_v15, %v59_v24  ;;  %v2044_v45 = vld [vmem:[%s2841_s3 + $0x24c] ss:$16 sps:$4 sm:$0xff]   ;;  %v2039_v48 = vld [vmem:[%s2841_s3 + $0x240] ss:$16 sps:$4 sm:$0xff]   ;;  %v2042_v49 = vld [vmem:[%s2841_s3 + $0x248] ss:$16 sps:$4 sm:$0xff]  }
  0x53   :  { %v2047_v51 = vld [vmem:[%s2841_s3 + $0x264] ss:$16 sps:$4 sm:$0xff]   ;;  %v2050_v52 = vld [vmem:[%s2841_s3 + $0x26c] ss:$16 sps:$4 sm:$0xff]   ;;  %v2045_v53 = vld [vmem:[%s2841_s3 + $0x260] ss:$16 sps:$4 sm:$0xff]  }
  0x54   :  { %v2048_v54 = vld [vmem:[%s2841_s3 + $0x268] ss:$16 sps:$4 sm:$0xff]   ;;  %v2053_v55 = vld [vmem:[%s2841_s3 + $0x284] ss:$16 sps:$4 sm:$0xff]   ;;  %v2056_v56 = vld [vmem:[%s2841_s3 + $0x28c] ss:$16 sps:$4 sm:$0xff]  }
  0x55   :  { %v2051_v57 = vld [vmem:[%s2841_s3 + $0x280] ss:$16 sps:$4 sm:$0xff]   ;;  %v2054_v58 = vld [vmem:[%s2841_s3 + $0x288] ss:$16 sps:$4 sm:$0xff]   ;;  %v2059_v59 = vld [vmem:[%s2841_s3 + $0x2a4] ss:$16 sps:$4 sm:$0xff]  }
  0x56   :  { %v2062_v60 = vld [vmem:[%s2841_s3 + $0x2ac] ss:$16 sps:$4 sm:$0xff]   ;;  %v2057_v61 = vld [vmem:[%s2841_s3 + $0x2a0] ss:$16 sps:$4 sm:$0xff]   ;;  %v2060_v62 = vld [vmem:[%s2841_s3 + $0x2a8] ss:$16 sps:$4 sm:$0xff]  }
  0x57   :  { %v2065_v63 = vld [vmem:[%s2841_s3 + $0x2c4] ss:$16 sps:$4 sm:$0xff]   ;;  %v2068_v0 = vld [vmem:[%s2841_s3 + $0x2cc] ss:$16 sps:$4 sm:$0xff]   ;;  %v2063_v1 = vld [vmem:[%s2841_s3 + $0x2c0] ss:$16 sps:$4 sm:$0xff]  }
  0x58   :  { %v2066_v2 = vld [vmem:[%s2841_s3 + $0x2c8] ss:$16 sps:$4 sm:$0xff]   ;;  %v2071_v3 = vld [vmem:[%s2841_s3 + $0x2e4] ss:$16 sps:$4 sm:$0xff]   ;;  %v2074_v4 = vld [vmem:[%s2841_s3 + $0x2ec] ss:$16 sps:$4 sm:$0xff]  }
  0x59   :  { %v2069_v5 = vld [vmem:[%s2841_s3 + $0x2e0] ss:$16 sps:$4 sm:$0xff]   ;;  %v2072_v6 = vld [vmem:[%s2841_s3 + $0x2e8] ss:$16 sps:$4 sm:$0xff]   ;;  %v2077_v7 = vld [vmem:[%s2841_s3 + $0x304] ss:$16 sps:$4 sm:$0xff]  }
  0x5a   :  { %v2080_v8 = vld [vmem:[%s2841_s3 + $0x30c] ss:$16 sps:$4 sm:$0xff]   ;;  %v2075_v9 = vld [vmem:[%s2841_s3 + $0x300] ss:$16 sps:$4 sm:$0xff]   ;;  %v2078_v10 = vld [vmem:[%s2841_s3 + $0x308] ss:$16 sps:$4 sm:$0xff]  }
  0x5b   :  { %v2083_v11 = vld [vmem:[%s2841_s3 + $0x324] ss:$16 sps:$4 sm:$0xff]   ;;  %v2086_v12 = vld [vmem:[%s2841_s3 + $0x32c] ss:$16 sps:$4 sm:$0xff]  }
  0xdd   :  { %v143_v19 = vpop.f32.mrb[0].mxu1 }
  0xde   :  { %v144_v20 = vadd.f32 %v143_v19, %v48_v17  ;;  %v145_v21 = vpop.f32.mrb[1].mxu1  ;;  %v2081_v17 = vld [vmem:[%s2841_s3 + $0x320] ss:$16 sps:$4 sm:$0xff]   ;;  %v2089_v19 = vld [vmem:[%s2841_s3 + $0x344] ss:$16 sps:$4 sm:$0xff]  }
  0xdf   :  { %v146_v22 = vadd.f32 %v145_v21, %v52_v18  ;;  %v147_v23 = vpop.f32.mrb[2].mxu1  ;;  %v2084_v18 = vld [vmem:[%s2841_s3 + $0x328] ss:$16 sps:$4 sm:$0xff]   ;;  %v2087_v21 = vld [vmem:[%s2841_s3 + $0x340] ss:$16 sps:$4 sm:$0xff]  }
  0xe0   :  { %vm191_vm1 = vcmp.gt.f32.partialorder %v144_v20, 0.0  ;;  %v195_v25 = vmul.f32 0.2, %v144_v20  ;;  %v148_v26 = vpop.f32.mrb[3].mxu1  ;;  %v2095_v23 = vld [vmem:[%s2841_s3 + $0x364] ss:$16 sps:$4 sm:$0xff]  }
  0xe1   :  { %v196_v27 = vmul.f32 0.2, %v146_v22  ;;  %vm192_vm2 = vcmp.gt.f32.partialorder %v146_v22, 0.0  ;;  %v2093_v26 = vld [vmem:[%s2841_s3 + $0x360] ss:$16 sps:$4 sm:$0xff]  }
  0xe2   :  { %v199_v28 = vsel %vm191_vm1, %v144_v20, %v195_v25  ;;  %v2092_v20 = vld [vmem:[%s2841_s3 + $0x34c] ss:$16 sps:$4 sm:$0xff]  }
  0xe3   :  { %v200_v29 = vsel %vm192_vm2, %v146_v22, %v196_v27  ;;  %v203_v34 = vpack.c.bf16 %v199_v28, %v199_v28  ;;  %v2090_v22 = vld [vmem:[%s2841_s3 + $0x348] ss:$16 sps:$4 sm:$0xff]   ;;  %v2098_v25 = vld [vmem:[%s2841_s3 + $0x36c] ss:$16 sps:$4 sm:$0xff]   ;;  %v2101_v28 = vld [vmem:[%s2841_s3 + $0x384] ss:$16 sps:$4 sm:$0xff]  }
  0xe4   :  { %v204_v31 = vpack.c.bf16 %v200_v29, %v200_v29  ;;  %v2096_v27 = vld [vmem:[%s2841_s3 + $0x368] ss:$16 sps:$4 sm:$0xff]   ;;  %v2104_v29 = vld [vmem:[%s2841_s3 + $0x38c] ss:$16 sps:$4 sm:$0xff]  }
  0xe5   :  { %v2499_v37 = vpop.f32.mrb[4].mxu1 }
  0xe6   :  { %1029 = vmatprep.mubr.bf16.mxu0 %v204_v31  ;;  %1111 = vmatprep.mubr.bf16.mxu1 %v204_v31  ;;  %v186_v38 = vpop.f32.mrb[5].mxu1  ;;  %v2099_v31 = vld [vmem:[%s2841_s3 + $0x380] ss:$16 sps:$4 sm:$0xff]  }
  0xe7   :  { %1030 = vmatmul.mubr.bf16.vlgmr.msra.gmra.mrb[0].mxu0 %v203_v34  ;;  %1112 = vmatmul.mubr.bf16.vlgmr.msra.gmra.mrb[8].mxu1 %v203_v34  ;;  %v187_v40 = vadd.f32 %v186_v38, %v60_v30  ;;  %v188_v41 = vpop.f32.mrb[6].mxu1  ;;  %v55_v30 = vsub.s32 2, %v2468_v13  ;;  %v2110_v34 = vld [vmem:[%s2841_s3 + $0x3ac] ss:$16 sps:$4 sm:$0xff]   ;;  %v2108_v38 = vld [vmem:[%s2841_s3 + $0x3a8] ss:$16 sps:$4 sm:$0xff]  }
  0xe8   :  { %1039 = vmatpush1.bf16.msra.mxu0 %v2027_v32  ;;  %1121 = vmatpush1.bf16.msra.mxu1 %v2030_v33  ;;  %v189_v44 = vpop.f32.mrb[7].mxu1  ;;  %v2102_v32 = vld [vmem:[%s2841_s3 + $0x388] ss:$16 sps:$4 sm:$0xff]   ;;  %v2107_v33 = vld [vmem:[%s2841_s3 + $0x3a4] ss:$16 sps:$4 sm:$0xff]  }
  0xe9   :  { %1040 = vmatprep.subr.bf16.mxu0 %v2035_v35  ;;  %1122 = vmatprep.subr.bf16.mxu1 %v2038_v36  ;;  %vm194_vm3 = vcmp.gt.f32.partialorder %v187_v40, 0.0  ;;  %v198_v46 = vmul.f32 0.2, %v187_v40  ;;  %v56_v35 = vrot.slane %v2474_v15, %v55_v30  ;;  %v2105_v36 = vld [vmem:[%s2841_s3 + $0x3a0] ss:$16 sps:$4 sm:$0xff]  }
  0xea   :  { %v2116_v15 = vld [vmem:[%s2841_s3 + $0x3cc] ss:$16 sps:$4 sm:$0xff]   ;;  %v2111_v41 = vld [vmem:[%s2841_s3 + $0x3c0] ss:$16 sps:$4 sm:$0xff]  }
  0xeb   :  { %v202_v47 = vsel %vm194_vm3, %v187_v40, %v198_v46  ;;  %v185_v40 = vadd.f32 %v2499_v37, %v56_v35  ;;  %v2122_v37 = vld [vmem:[%s2841_s3 + $0x3ec] ss:$16 sps:$4 sm:$0xff]   ;;  %v2120_v46 = vld [vmem:[%s2841_s3 + $0x3e8] ss:$16 sps:$4 sm:$0xff]  }
  0xec   :  { %1041 = vmatpush1.bf16.msra.mxu0 %v2033_v39  ;;  %1123 = vmatpush1.bf16.msra.mxu1 %v2036_v42  ;;  %v206_v50 = vpack.c.bf16 %v202_v47, %v202_v47  ;;  %v2113_v39 = vld [vmem:[%s2841_s3 + $0x3c4] ss:$16 sps:$4 sm:$0xff]   ;;  %v2114_v42 = vld [vmem:[%s2841_s3 + $0x3c8] ss:$16 sps:$4 sm:$0xff]  }
  0xed   :  { %1042 = vmatprep.subr.bf16.mxu0 %v2041_v43  ;;  %1124 = vmatprep.subr.bf16.mxu1 %v2044_v45  ;;  %v2119_v43 = vld [vmem:[%s2841_s3 + $0x3e4] ss:$16 sps:$4 sm:$0xff]   ;;  %v197_v44 = vmul.f32 0.2, %v185_v40  ;;  %vm193_vm4 = vcmp.gt.f32.partialorder %v185_v40, 0.0 }
  0xee   :  { %1070 = vmatprep.mubr.bf16.mxu0 %v206_v50  ;;  %1152 = vmatprep.mubr.bf16.mxu1 %v206_v50  ;;  %v2117_v45 = vld [vmem:[%s2841_s3 + $0x3e0] ss:$16 sps:$4 sm:$0xff]  }
  0xef   :  { %v2123_v47 = vld [vmem:[%s2843_s5 + $0x40] sm:$0xff]  }
  0xf0   :  { %1043 = vmatpush1.bf16.msra.mxu0 %v2039_v48  ;;  %1125 = vmatpush1.bf16.msra.mxu1 %v2042_v49  ;;  %v2124_v48 = vld [vmem:[%s2843_s5 + $0xc0] sm:$0xff]   ;;  %v201_v49 = vsel %vm193_vm4, %v185_v40, %v197_v44 }
  0xf1   :  { %1044 = vmatprep.subr.bf16.mxu0 %v2047_v51  ;;  %1126 = vmatprep.subr.bf16.mxu1 %v2050_v52  ;;  %v2125_v50 = vld [vmem:[%s2843_s5] sm:$0xff]   ;;  %v205_v52 = vpack.c.bf16 %v201_v49, %v201_v49  ;;  %v2157_v49 = vld [vmem:[%s2845_s7 + $0x10] sm:$0xff]  }
  0xf2   :  { %v2126_v51 = vld [vmem:[%s2843_s5 + $0x80] sm:$0xff]  }
  0xf4   :  { %1045 = vmatpush1.bf16.msra.mxu0 %v2045_v53  ;;  %1127 = vmatpush1.bf16.msra.mxu1 %v2048_v54  ;;  %v2127_v53 = vld [vmem:[%s2843_s5 + $0x48] sm:$0xff]  }
  0xf5   :  { %1046 = vmatprep.subr.bf16.mxu0 %v2053_v55  ;;  %1128 = vmatprep.subr.bf16.mxu1 %v2056_v56  ;;  %v2128_v54 = vld [vmem:[%s2843_s5 + $0xc8] sm:$0xff]  }
  0xf6   :  { %v2129_v55 = vld [vmem:[%s2843_s5 + $0x8] sm:$0xff]  }
  0xf7   :  { %v2130_v56 = vld [vmem:[%s2843_s5 + $0x88] sm:$0xff]  }
  0xf8   :  { %1047 = vmatpush1.bf16.msra.mxu0 %v2051_v57  ;;  %1129 = vmatpush1.bf16.msra.mxu1 %v2054_v58  ;;  %v2131_v57 = vld [vmem:[%s2843_s5 + $0x50] sm:$0xff]  }
  0xf9   :  { %1048 = vmatprep.subr.bf16.mxu0 %v2059_v59  ;;  %1130 = vmatprep.subr.bf16.mxu1 %v2062_v60  ;;  %v2132_v58 = vld [vmem:[%s2843_s5 + $0xd0] sm:$0xff]  }
  0xfa   :  { %v2133_v59 = vld [vmem:[%s2843_s5 + $0x10] sm:$0xff]  }
  0xfb   :  { %v2134_v60 = vld [vmem:[%s2843_s5 + $0x90] sm:$0xff]  }
  0xfc   :  { %1049 = vmatpush1.bf16.msra.mxu0 %v2057_v61  ;;  %1131 = vmatpush1.bf16.msra.mxu1 %v2060_v62  ;;  %v2135_v61 = vld [vmem:[%s2843_s5 + $0x58] sm:$0xff]  }
  0xfd   :  { %1050 = vmatprep.subr.bf16.mxu0 %v2065_v63  ;;  %1132 = vmatprep.subr.bf16.mxu1 %v2068_v0  ;;  %v2136_v62 = vld [vmem:[%s2843_s5 + $0xd8] sm:$0xff]  }
  0xfe   :  { %v2137_v63 = vld [vmem:[%s2843_s5 + $0x18] sm:$0xff]  }
  0xff   :  { %v2138_v0 = vld [vmem:[%s2843_s5 + $0x98] sm:$0xff]  }
 0x100   :  { %1051 = vmatpush1.bf16.msra.mxu0 %v2063_v1  ;;  %1133 = vmatpush1.bf16.msra.mxu1 %v2066_v2  ;;  %v2139_v1 = vld [vmem:[%s2843_s5 + $0x60] sm:$0xff]  }
 0x101   :  { %1052 = vmatprep.subr.bf16.mxu0 %v2071_v3  ;;  %1134 = vmatprep.subr.bf16.mxu1 %v2074_v4  ;;  %v2140_v2 = vld [vmem:[%s2843_s5 + $0xe0] sm:$0xff]  }
 0x102   :  { %v2141_v3 = vld [vmem:[%s2843_s5 + $0x20] sm:$0xff]  }
 0x103   :  { %v2142_v4 = vld [vmem:[%s2843_s5 + $0xa0] sm:$0xff]  }
 0x104   :  { %1053 = vmatpush1.bf16.msra.mxu0 %v2069_v5  ;;  %1135 = vmatpush1.bf16.msra.mxu1 %v2072_v6  ;;  %v2143_v5 = vld [vmem:[%s2843_s5 + $0x68] sm:$0xff]  }
 0x105   :  { %1054 = vmatprep.subr.bf16.mxu0 %v2077_v7  ;;  %1136 = vmatprep.subr.bf16.mxu1 %v2080_v8  ;;  %v2144_v6 = vld [vmem:[%s2843_s5 + $0xe8] sm:$0xff]  }
 0x106   :  { %v2145_v7 = vld [vmem:[%s2843_s5 + $0x28] sm:$0xff]  }
 0x107   :  { %v2146_v8 = vld [vmem:[%s2843_s5 + $0xa8] sm:$0xff]  }
 0x108   :  { %1055 = vmatpush1.bf16.msra.mxu0 %v2075_v9  ;;  %1137 = vmatpush1.bf16.msra.mxu1 %v2078_v10  ;;  %v2147_v9 = vld [vmem:[%s2843_s5 + $0x70] sm:$0xff]  }
 0x109   :  { %1056 = vmatprep.subr.bf16.mxu0 %v2083_v11  ;;  %1138 = vmatprep.subr.bf16.mxu1 %v2086_v12  ;;  %v2148_v10 = vld [vmem:[%s2843_s5 + $0xf0] sm:$0xff]  }
 0x10a   :  { %v2149_v11 = vld [vmem:[%s2843_s5 + $0x30] sm:$0xff]  }
 0x10b   :  { %v2150_v12 = vld [vmem:[%s2843_s5 + $0xb0] sm:$0xff]  }
 0x10c   :  { %1057 = vmatpush1.bf16.msra.mxu0 %v2081_v17  ;;  %1139 = vmatpush1.bf16.msra.mxu1 %v2084_v18  ;;  %v2151_v17 = vld [vmem:[%s2843_s5 + $0x78] sm:$0xff]  }
 0x10d   :  { %1058 = vmatprep.subr.bf16.mxu0 %v2089_v19  ;;  %1140 = vmatprep.subr.bf16.mxu1 %v2092_v20  ;;  %v2152_v18 = vld [vmem:[%s2843_s5 + $0xf8] sm:$0xff]  }
 0x10e   :  { %v2153_v19 = vld [vmem:[%s2843_s5 + $0x38] sm:$0xff]  }
 0x10f   :  { %v2154_v20 = vld [vmem:[%s2843_s5 + $0xb8] sm:$0xff]  }
 0x110   :  { %1059 = vmatpush1.bf16.msra.mxu0 %v2087_v21  ;;  %1141 = vmatpush1.bf16.msra.mxu1 %v2090_v22  ;;  %v2188_v21 = vmov 0.0   ;;  %v335_v22 = vld [vmem:[%s2842_s4] sm:$0xf] }
 0x111   :  { %1060 = vmatprep.subr.bf16.mxu0 %v2095_v23  ;;  %1142 = vmatprep.subr.bf16.mxu1 %v2098_v25  ;;  %v340_v23 = vrot.slane %v335_v22, %v47_v14  ;;  %v348_v25 = vrot.slane %v335_v22, %v55_v30 }
 0x114   :  { %1061 = vmatpush1.bf16.msra.mxu0 %v2093_v26  ;;  %1143 = vmatpush1.bf16.msra.mxu1 %v2096_v27  ;;  %v344_v26 = vrot.slane %v335_v22, %v51_v16  ;;  %v352_v27 = vrot.slane %v335_v22, %v59_v24 }
 0x115   :  { %1062 = vmatprep.subr.bf16.mxu0 %v2101_v28  ;;  %1144 = vmatprep.subr.bf16.mxu1 %v2104_v29 }
 0x118   :  { %1063 = vmatpush1.bf16.msra.mxu0 %v2099_v31  ;;  %1145 = vmatpush1.bf16.msra.mxu1 %v2102_v32 }
 0x119   :  { %1064 = vmatprep.subr.bf16.mxu0 %v2107_v33  ;;  %1146 = vmatprep.subr.bf16.mxu1 %v2110_v34 }
 0x11c   :  { %1065 = vmatpush1.bf16.msra.mxu0 %v2105_v36  ;;  %1147 = vmatpush1.bf16.msra.mxu1 %v2108_v38 }
 0x11d   :  { %1066 = vmatprep.subr.bf16.mxu0 %v2113_v39  ;;  %1148 = vmatprep.subr.bf16.mxu1 %v2116_v15 }
 0x120   :  { %1067 = vmatpush1.bf16.msra.mxu0 %v2111_v41  ;;  %1149 = vmatpush1.bf16.msra.mxu1 %v2114_v42 }
 0x121   :  { %1068 = vmatprep.subr.bf16.mxu0 %v2119_v43  ;;  %1150 = vmatprep.subr.bf16.mxu1 %v2122_v37 }
 0x124   :  { %1069 = vmatpush1.bf16.msra.mxu0 %v2117_v45  ;;  %1151 = vmatpush1.bf16.msra.mxu1 %v2120_v46  ;;  %v2155_v45 = vld [vmem:[%s2845_s7] sm:$0xff]  }
 0x125   :  { %1830 = vmatprep.subr.bf16.mxu0 %v2123_v47  ;;  %1852 = vmatprep.subr.bf16.mxu1 %v2124_v48  ;;  %v2156_v48 = vld [vmem:[%s2845_s7 + $0x8] sm:$0xff]  }
 0x127   :  { %1071 = vmatmul.mubr.bf16.vlgmr.msra.gmra.mrb[0].mxu0 %v205_v52  ;;  %1153 = vmatmul.mubr.bf16.vlgmr.msra.gmra.mrb[8].mxu1 %v205_v52  ;;  %v2160_v52 = vld [vmem:[%s2845_s7 + $0x28] sm:$0xff]  }
 0x128   :  { %1831 = vmatpush3.bf16.msra.mxu0 %v2125_v50  ;;  %1853 = vmatpush3.bf16.msra.mxu1 %v2126_v51  ;;  %v2158_v50 = vld [vmem:[%s2845_s7 + $0x18] sm:$0xff]   ;;  %v2159_v51 = vld [vmem:[%s2845_s7 + $0x20] sm:$0xff]  }
 0x129   :  { %1832 = vmatprep.subr.bf16.mxu0 %v2127_v53  ;;  %1854 = vmatprep.subr.bf16.mxu1 %v2128_v54  ;;  %v2161_v53 = vld [vmem:[%s2845_s7 + $0x30] sm:$0xff]   ;;  %v2162_v54 = vld [vmem:[%s2845_s7 + $0x38] sm:$0xff]  }
 0x12c   :  { %1833 = vmatpush3.bf16.msra.mxu0 %v2129_v55  ;;  %1855 = vmatpush3.bf16.msra.mxu1 %v2130_v56 }
 0x12d   :  { %1834 = vmatprep.subr.bf16.mxu0 %v2131_v57  ;;  %1856 = vmatprep.subr.bf16.mxu1 %v2132_v58  ;;  %v1788_v57 = vld [vmem:[%s2844_s6] ss:$0 sm:$0xff]  ;;  %s2190_s6 = smov [#allocation2]  }
 0x12e   :  { %s1642_s3 = sshll.u32 %s2190_s6, 4  ;;  %s1643_s3 = int_to_ptr.vmem [resolvable:$true] %s1642_s3 }
 0x12f   :  { %s2163_s12 = scalar_lea.vmem %s1643_s3, 128  ;;  %p2168_p1 = scmp.lt.s32.totalorder %s1643_s3, %s1643_s3 }
 0x130   :  { %1835 = vmatpush3.bf16.msra.mxu0 %v2133_v59  ;;  %1857 = vmatpush3.bf16.msra.mxu1 %v2134_v60  ;;  %p2164_p0 = scmp.ne.s32.totalorder %s1643_s3, %s2163_s12  ;;  %p2169_p2 = scmp.lt.s32.totalorder %s2163_s12, %s2163_s12 }
 0x131   :  { %1836 = vmatprep.subr.bf16.mxu0 %v2135_v61  ;;  %1858 = vmatprep.subr.bf16.mxu1 %v2136_v62 }
 0x132   :  { %p2170_p3 = por %p2169_p2, %p2168_p1 }
 0x134   :  { %1837 = vmatpush3.bf16.msra.mxu0 %v2137_v63  ;;  %1859 = vmatpush3.bf16.msra.mxu1 %v2138_v0  ;;  %p2171_p4 = pnand %p2170_p3, %p2164_p0 }
 0x135   :  { %1838 = vmatprep.subr.bf16.mxu0 %v2139_v1  ;;  %1860 = vmatprep.subr.bf16.mxu1 %v2140_v2 }
 0x138   :  { %1839 = vmatpush3.bf16.msra.mxu0 %v2141_v3  ;;  %1861 = vmatpush3.bf16.msra.mxu1 %v2142_v4 }
 0x139   :  { %1840 = vmatprep.subr.bf16.mxu0 %v2143_v5  ;;  %1862 = vmatprep.subr.bf16.mxu1 %v2144_v6 }
 0x13c   :  { %1841 = vmatpush3.bf16.msra.mxu0 %v2145_v7  ;;  %1863 = vmatpush3.bf16.msra.mxu1 %v2146_v8  ;;  %v1821_v7 = vld [vmem:[%s2846_s8] ss:$0 sm:$0xff] }
 0x13d   :  { %1842 = vmatprep.subr.bf16.mxu0 %v2147_v9  ;;  %1864 = vmatprep.subr.bf16.mxu1 %v2148_v10 }
 0x140   :  { %1843 = vmatpush3.bf16.msra.mxu0 %v2149_v11  ;;  %1865 = vmatpush3.bf16.msra.mxu1 %v2150_v12 }
 0x141   :  { %1844 = vmatprep.subr.bf16.mxu0 %v2151_v17  ;;  %1866 = vmatprep.subr.bf16.mxu1 %v2152_v18 }
 0x144   :  { %1845 = vmatpush3.bf16.msra.mxu0 %v2153_v19  ;;  %1867 = vmatpush3.bf16.msra.mxu1 %v2154_v20 }
 0x145   :  { %1883 = vmatprep.subr.bf16.mxu0 %v2188_v21 }
 0x1fa   :  { %v1072_v28 = vpop.f32.mrb[0].mxu0  ;;  %v1154_v29 = vpop.f32.mrb[8].mxu1 }
 0x1fb   :  { %v1903_v31 = vadd.f32 %v1072_v28, %v340_v23  ;;  %v1905_v32 = vadd.f32 %v1154_v29, %v348_v25  ;;  %v1074_v33 = vpop.f32.mrb[1].mxu0  ;;  %v1156_v34 = vpop.f32.mrb[9].mxu1 }
 0x1fc   :  { %v1904_v35 = vadd.f32 %v1074_v33, %v344_v26  ;;  %v1906_v36 = vadd.f32 %v1156_v34, %v352_v27  ;;  %v1076_v38 = vpop.f32.mrb[2].mxu0  ;;  %v1158_v39 = vpop.f32.mrb[10].mxu1 }
 0x1fd   :  { %vm1161_vm5 = vcmp.gt.f32.partialorder %v1903_v31, 0.0  ;;  %v1165_v14 = vmul.f32 0.2, %v1903_v31  ;;  %vm1163_vm6 = vcmp.gt.f32.partialorder %v1905_v32, 0.0  ;;  %v1167_v30 = vmul.f32 0.2, %v1905_v32 }
 0x1fe   :  { %vm1162_vm7 = vcmp.gt.f32.partialorder %v1904_v35, 0.0  ;;  %v1166_v15 = vmul.f32 0.2, %v1904_v35  ;;  %vm1164_vm8 = vcmp.gt.f32.partialorder %v1906_v36, 0.0  ;;  %v1168_v16 = vmul.f32 0.2, %v1906_v36 }
 0x1ff   :  { %v1169_v13 = vsel %vm1161_vm5, %v1903_v31, %v1165_v14  ;;  %v1171_v24 = vsel %vm1163_vm6, %v1905_v32, %v1167_v30  ;;  %v1077_v40 = vpop.f32.mrb[3].mxu0  ;;  %v1159_v41 = vpop.f32.mrb[11].mxu1 }
 0x200   :  { %v1170_v42 = vsel %vm1162_vm7, %v1904_v35, %v1166_v15  ;;  %v1172_v43 = vsel %vm1164_vm8, %v1906_v36, %v1168_v16  ;;  %v1173_v46 = vpack.c.bf16 %v1169_v13, %v1169_v13  ;;  %v1175_v47 = vpack.c.bf16 %v1171_v24, %v1171_v24 }
 0x201   :  { %v1174_v37 = vpack.c.bf16 %v1170_v42, %v1170_v42  ;;  %v1176_v44 = vpack.c.bf16 %v1172_v43, %v1172_v43 }
 0x203   :  { %1472 = vmatprep.mubr.bf16.mxu0 %v1174_v37  ;;  %1512 = vmatprep.mubr.bf16.mxu1 %v1176_v44 }
 0x204   :  { %1473 = vmatmul.mubr.bf16.vlgmr.msra.gmra.mrb[4].mxu0 %v1173_v46  ;;  %1513 = vmatmul.mubr.bf16.vlgmr.msra.gmra.mrb[12].mxu1 %v1175_v47 }
 0x205   :  { %1884 = vmatpush3.bf16.msra.mxu0 %v2155_v45  ;;  %1899 = vmatprep.mubr.msk.bf16.mxu0 %vm2189_vm9, %v2188_v21 }
 0x206   :  { %1885 = vmatprep.subr.bf16.mxu0 %v2188_v21 }
 0x209   :  { %1886 = vmatpush3.bf16.msra.mxu0 %v2156_v48 }
 0x20a   :  { %1887 = vmatprep.subr.bf16.mxu0 %v2188_v21 }
 0x20d   :  { %1888 = vmatpush3.bf16.msra.mxu0 %v2157_v49 }
 0x20e   :  { %1889 = vmatprep.subr.bf16.mxu0 %v2188_v21 }
 0x211   :  { %1890 = vmatpush3.bf16.msra.mxu0 %v2158_v50 }
 0x212   :  { %1891 = vmatprep.subr.bf16.mxu0 %v2188_v21 }
 0x215   :  { %1892 = vmatpush3.bf16.msra.mxu0 %v2159_v51 }
 0x216   :  { %1893 = vmatprep.subr.bf16.mxu0 %v2188_v21 }
 0x219   :  { %1894 = vmatpush3.bf16.msra.mxu0 %v2160_v52 }
 0x21a   :  { %1895 = vmatprep.subr.bf16.mxu0 %v2188_v21 }
 0x21d   :  { %1896 = vmatpush3.bf16.msra.mxu0 %v2161_v53 }
 0x21e   :  { %1897 = vmatprep.subr.bf16.mxu0 %v2188_v21 }
 0x221   :  { %1898 = vmatpush3.bf16.msra.mxu0 %v2162_v54 }
 0x2d7   :  { %v1846_v55 = vpop.f32.mrb[4].mxu0  ;;  %v1868_v56 = vpop.f32.mrb[12].mxu1 }
 0x2d8   :  { %v1847_v58 = vpop.f32.mrb[5].mxu0  ;;  %v1869_v59 = vpop.f32.mrb[13].mxu1 }
 0x2d9   :  { %v1848_v60 = vadd.f32 %v1847_v58, %v1846_v55  ;;  %v1870_v61 = vadd.f32 %v1869_v59, %v1868_v56  ;;  %v1849_v62 = vpop.f32.mrb[6].mxu0  ;;  %v1871_v63 = vpop.f32.mrb[14].mxu1 }
 0x2da   :  { %v1850_v0 = vpop.f32.mrb[7].mxu0  ;;  %v1872_v1 = vpop.f32.mrb[15].mxu1 }
 0x2db   :  { %v1475_v2 = vadd.f32 %v1848_v60, %v1788_v57 }
 0x2dd   :  { %v1515_v3 = vadd.f32 %v1870_v61, %v1475_v2 }
 0x2df   :  { %vm1520_vm10 = vcmp.gt.f32.partialorder %v1515_v3, 0.0  ;;  %v1521_v4 = vmul.f32 0.2, %v1515_v3 }
 0x2e1   :  { %v1522_v5 = vsel %vm1520_vm10, %v1515_v3, %v1521_v4 }
 0x2e2   :  { %v1523_v6 = vpack.c.bf16 %v1522_v5, %v1522_v5 }
 0x2e4   :  { %1900 = vmatmul.mubr.bf16.vlgmr.msra.gmra.mrb[8].mxu0 %v1523_v6 }
 0x3b7   :  { %v1629_v8 = vpop.f32.mrb[8].mxu0 }
 0x3b8   :  { %v1630_v9 = vadd.f32 %v1821_v7, %v1629_v8  ;;  %v1901_v10 = vpop.f32.mrb[9].mxu0 }
 0x3b9   :  { %v1632_v11 = vpop.f32.mrb[10].mxu0 }
 0x3ba   :  { %1635 = vst [vmem:[#allocation2] sm:$0xff] %v1630_v9  ;;  %v1902_v12 = vpop.f32.mrb[11].mxu0 }
 0x3bb   :  { %2174 = shalt.err (!%p2171_p4)
}
 0x3bc   :  { %s2175_s8 = scalar_lea.hbm %s2847_s9, 128 }
 0x3bd   :  { %p2176_p5 = scmp.ne.s32.totalorder %s2847_s9, %s2175_s8  ;;  %p2179_p6 = scmp.lt.u32.totalorder %s2175_s8, %s2847_s9 }
 0x3bf   :  { %p2181_p7 = pnand %p2179_p6, %p2176_p5 }
 0x3c1   :  { %2184 = shalt.err (!%p2181_p7)
}
 0x3c2   :  { %1645 = dma.vmem_to_hbm [thread:$0]  %s1643_s3, 128, %s2847_s9, [#allocation3]  }
 0x3c3   :  { %2185 = dma.done.wait [#allocation3], 128  }
 0x3c4   :  { %2186 = vsyncadd [#allocation3], 4294967168 }
 0x3c5   :  { %1649 = vsyncpa [#allocation3], 1 }

</bundles_post_ra>
